<compile_context>
chip_gen: v7x
topology: tpu7x:2x2x1
jax: 0.10.0
libtpu: 0.0.40
codegen_flags: <defaults>
</compile_context>

<pallas_src>
import math

import jax
import jax.numpy as jnp
from jax.experimental import pallas as pl
from jax.experimental.pallas import tpu as pltpu

NEG_SLOPE = 0.01   # F.leaky_relu default negative_slope
BN_EPS = 1e-5      # nn.BatchNorm1d default eps
LANE = 128         # TPU vreg lane width


def _round_up(x, m):
    return ((x + m - 1) // m) * m


def _leaky_relu(x):
    # mul + max (2 VPU ops) instead of cmp + select + mul (3 ops).
    return jnp.maximum(x, NEG_SLOPE * x)


# --------------------------------------------------------------------------------------
# Fused kernel: one (tm, in_p) row tile of x -> one (tm, out_p) row tile of the output.
# Weights/biases are whole-array resident blocks (constant block index every grid step).
# --------------------------------------------------------------------------------------
def output_net_kernel(x_ref, w1_ref, b1_ref, w2_ref, b2_ref, w3_ref, b3_ref, o_ref):
    # Cast x to the weight compute dtype in-kernel (free under the MXU; avoids a
    # separate wrapper-side astype pass through HBM).
    x = x_ref[...].astype(w1_ref.dtype)

    # fc1 (+ folded bn1) + leaky_relu            (dropout = identity in eval)
    h1 = jnp.dot(x, w1_ref[...], preferred_element_type=jnp.float32) + b1_ref[...]
    h1 = _leaky_relu(h1)

    # fc2 (+ folded bn2) + leaky_relu
    h2 = jnp.dot(h1.astype(w2_ref.dtype), w2_ref[...],
                 preferred_element_type=jnp.float32) + b2_ref[...]
    h2 = _leaky_relu(h2)

    # fc3
    out = jnp.dot(h2.astype(w3_ref.dtype), w3_ref[...],
                  preferred_element_type=jnp.float32) + b3_ref[...]
    o_ref[...] = out.astype(o_ref.dtype)


# --------------------------------------------------------------------------------------
# Parameter construction (raw, PyTorch-equivalent shapes) and kernel preparation
# (BN folding in f32 + lane padding + cast to the compute dtype).
# --------------------------------------------------------------------------------------
def init_params(key, in_dim, out_dim):
    """Deterministic synthetic parameters matching OutputNetwork.__init__ shapes."""
    h1 = max(in_dim - 256, 64)
    h2 = max(h1 - 256, 64)
    ks = jax.random.split(key, 16)

    def linear(kw, kb, fan_in, fan_out):
        bound = 1.0 / math.sqrt(fan_in)
        w_t = jax.random.uniform(kw, (fan_in, fan_out), jnp.float32, -bound, bound)  # W.T
        b = jax.random.uniform(kb, (1, fan_out), jnp.float32, -bound, bound)
        return w_t, b

    def batchnorm(kg, kb, km, kv, dim):
        gamma = jax.random.uniform(kg, (1, dim), jnp.float32, 0.5, 1.5)
        beta = jax.random.uniform(kb, (1, dim), jnp.float32, -0.5, 0.5)
        r_mean = 0.1 * jax.random.normal(km, (1, dim), jnp.float32)
        r_var = jax.random.uniform(kv, (1, dim), jnp.float32, 0.5, 1.5)
        # eval-mode BN folds to y = x * scale + shift
        scale = gamma / jnp.sqrt(r_var + BN_EPS)
        shift = beta - r_mean * scale
        return scale, shift

    w1t, b1 = linear(ks[0], ks[1], in_dim, h1)
    s1, t1 = batchnorm(ks[2], ks[3], ks[4], ks[5], h1)
    w2t, b2 = linear(ks[6], ks[7], h1, h2)
    s2, t2 = batchnorm(ks[8], ks[9], ks[10], ks[11], h2)
    w3t, b3 = linear(ks[12], ks[13], h2, out_dim)

    return dict(
        w1t=w1t, b1=b1, s1=s1, t1=t1,
        w2t=w2t, b2=b2, s2=s2, t2=t2,
        w3t=w3t, b3=b3,
        dims=(in_dim, h1, h2, out_dim),
    )


def prepare_kernel_params(params, compute_dtype=jnp.bfloat16):
    """Fold BN into the preceding Linear (in f32), zero-pad feature dims to multiples
    of 128 (deliberately NOT 256: the kernel is HBM-bound, not MXU-bound), then cast
    weights to the compute dtype.  Biases stay f32 (added to the f32 accumulator)."""
    in_dim, h1, h2, out_dim = params["dims"]
    in_p, h1_p, h2_p, out_p = (_round_up(d, LANE) for d in (in_dim, h1, h2, out_dim))

    # Fold eval-mode BN (y = h*scale + shift): w' = w*scale, b' = b*scale + shift.
    w1 = params["w1t"] * params["s1"]
    b1 = params["b1"] * params["s1"] + params["t1"]
    w2 = params["w2t"] * params["s2"]
    b2 = params["b2"] * params["s2"] + params["t2"]
    w3 = params["w3t"]
    b3 = params["b3"]

    def pad2(a, rows, cols):
        return jnp.pad(a, ((0, rows - a.shape[0]), (0, cols - a.shape[1])))

    return dict(
        w1=pad2(w1, in_p, h1_p).astype(compute_dtype),
        b1=pad2(b1, 1, h1_p).astype(jnp.float32),
        w2=pad2(w2, h1_p, h2_p).astype(compute_dtype),
        b2=pad2(b2, 1, h2_p).astype(jnp.float32),
        w3=pad2(w3, h2_p, out_p).astype(compute_dtype),
        b3=pad2(b3, 1, out_p).astype(jnp.float32),
        dims=params["dims"],
        padded_dims=(in_p, h1_p, h2_p, out_p),
    )


# --------------------------------------------------------------------------------------
# Row tiling: cap padding waste at 255 rows and guarantee >= 2 row tiles whenever
# m_pad >= 512 so the 'parallel' axis can feed both v7x TensorCores.
# --------------------------------------------------------------------------------------
def _row_tiling(M, tm_max):
    if M < 512:
        # Single full-extent row block (block == full dim is allowed even when M is
        # not a multiple of 8) -> no row-padding pass, grid=(1,).
        return M, M
    m_pad = _round_up(M, 256)
    tm_eff = 256
    cand = 512
    while cand <= tm_max:
        if m_pad % cand == 0 and m_pad // cand >= 2:
            tm_eff = cand
        cand += 256
    return m_pad, tm_eff


# --------------------------------------------------------------------------------------
# Wrapper
# --------------------------------------------------------------------------------------
def output_network_forward(x, kparams, *, tm=1024, single_buffer_weights=True):
    in_dim, h1, h2, out_dim = kparams["dims"]
    in_p, h1_p, h2_p, out_p = kparams["padded_dims"]

    original_shape = x.shape
    x2 = x.reshape(-1, original_shape[-1]) if x.ndim > 2 else x
    M = x2.shape[0]
    assert x2.shape[1] == in_dim

    m_pad, tm_eff = _row_tiling(M, tm)

    # Only touch x when padding is unavoidable (production callers should provide a
    # lane-aligned in_dim so this is a no-op); the dtype cast happens in-kernel.
    if m_pad != M or in_p != in_dim:
        x2 = jnp.pad(x2, ((0, m_pad - M), (0, in_p - in_dim)))

    grid = (m_pad // tm_eff,)

    w_dtype = kparams["w1"].dtype
    w_isize = jnp.dtype(w_dtype).itemsize
    x_isize = jnp.dtype(x2.dtype).itemsize
    o_isize = jnp.dtype(x.dtype).itemsize

    weight_elems = in_p * h1_p + h1_p * h2_p + h2_p * out_p
    bias_elems = h1_p + h2_p + out_p
    wbuf = 1 if single_buffer_weights else 2

    # Re-derived VMEM budget: resident weights/biases (x buffer count), double-buffered
    # x and out tiles, f32 intermediates; margin for compiler scratch; capped safely
    # below v7x's 64 MiB physical VMEM.
    vmem_bytes = (
        weight_elems * w_isize * wbuf
        + bias_elems * 4 * wbuf
        + 2 * tm_eff * in_p * x_isize
        + 2 * tm_eff * out_p * o_isize
        + tm_eff * (h1_p + h2_p) * 4
    )
    vmem_limit = min(max(int(vmem_bytes * 1.5) + (4 << 20), 32 << 20), 48 << 20)
    # TODO(synk): for very large in_dim (resident w1 approaching the v7x VMEM budget),
    # switch fc1 to a K-tiled grid axis with an f32 accumulator instead of resident w1.

    # Resident blocks never change their block index, so double-buffering them only
    # wastes VMEM -> single-buffer.
    w_mode = pl.Buffered(1) if single_buffer_weights else None

    def resident(rows, cols):
        return pl.BlockSpec((rows, cols), lambda i: (0, 0), pipeline_mode=w_mode)

    flops = 2 * m_pad * weight_elems
    bytes_accessed = (
        m_pad * in_p * x_isize
        + m_pad * out_p * o_isize
        + weight_elems * w_isize
        + bias_elems * 4
    )

    out = pl.pallas_call(
        output_net_kernel,
        out_shape=jax.ShapeDtypeStruct((m_pad, out_p), x.dtype),
        grid_spec=pltpu.PrefetchScalarGridSpec(
            num_scalar_prefetch=0,
            grid=grid,
            in_specs=[
                pl.BlockSpec((tm_eff, in_p), lambda i: (i, 0)),
                resident(in_p, h1_p), resident(1, h1_p),
                resident(h1_p, h2_p), resident(1, h2_p),
                resident(h2_p, out_p), resident(1, out_p),
            ],
            out_specs=pl.BlockSpec((tm_eff, out_p), lambda i: (i, 0)),
        ),
        compiler_params=pltpu.CompilerParams(
            dimension_semantics=("parallel",),   # independent row tiles (v7x megacore)
            vmem_limit_bytes=vmem_limit,
        ),
        cost_estimate=pl.CostEstimate(
            flops=flops, transcendentals=0, bytes_accessed=bytes_accessed),
    )(
        x2,
        kparams["w1"], kparams["b1"],
        kparams["w2"], kparams["b2"],
        kparams["w3"], kparams["b3"],
    )

    # NOTE: consumers that can read the padded (m_pad, out_p) slab directly should skip
    # this slice (it is an extra HBM pass); kept here to match the PyTorch output shape.
    out = out[:M, :out_dim]
    if x.ndim > 2:
        out = out.reshape(original_shape[0], original_shape[1], out_dim)
    return out


def output_network_reference(x, params):
    """Pure-JAX f32 reference of the same eval-mode forward (unfolded BN, unpadded)."""
    original_shape = x.shape
    h = x.reshape(-1, original_shape[-1]) if x.ndim > 2 else x
    h = _leaky_relu((h @ params["w1t"] + params["b1"]) * params["s1"] + params["t1"])
    h = _leaky_relu((h @ params["w2t"] + params["b2"]) * params["s2"] + params["t2"])
    h = h @ params["w3t"] + params["b3"]
    if x.ndim > 2:
        h = h.reshape(original_shape[0], original_shape[1], h.shape[-1])
    return h


if __name__ == "__main__":
    # TODO(synk): training-mode dropout (stochastic masking) and batch-statistic BN are
    # intentionally not reproduced; this kernel implements eval/inference semantics.
    in_dim, out_dim = 128, 32          # -> hidden_dim_1 = hidden_dim_2 = 64 (padded to 128)
    key = jax.random.PRNGKey(0)
    kx1, kx2, kx3, kp = jax.random.split(key, 4)

    params = init_params(kp, in_dim, out_dim)
    kparams_bf16 = prepare_kernel_params(params, compute_dtype=jnp.bfloat16)  # production path
    kparams_f32 = prepare_kernel_params(params, compute_dtype=jnp.float32)    # exactness check

    # Case 1: 3-D input (exercises the view(-1, in_dim) path), f32 weights, tight check
    # of the kernel math (BN fold, padding, full-extent row block).
    B, S = 2, 8
    x = jax.random.normal(kx1, (B, S, in_dim), jnp.float32)
    y = jax.block_until_ready(output_network_forward(x, kparams_f32))
    y_ref = output_network_reference(x, params)
    assert y.shape == (B, S, out_dim), y.shape
    assert jnp.allclose(y, y_ref, atol=1e-3, rtol=1e-3), "mismatch vs JAX reference (f32, 3-D)"

    # Case 2: 2-D input with rows not a multiple of 8 (single full-extent block, no padding
    # pass), bf16 production path -> looser tolerance (expected bf16 rounding, not a bug).
    x2d = jax.random.normal(kx2, (21, in_dim), jnp.float32)
    y2 = jax.block_until_ready(output_network_forward(x2d, kparams_bf16))
    y2_ref = output_network_reference(x2d, params)
    assert y2.shape == (21, out_dim), y2.shape
    assert jnp.allclose(y2, y2_ref, atol=5e-2, rtol=5e-2), "mismatch vs JAX reference (bf16, 2-D)"

    # Case 3: larger 2-D input -> exercises row padding to a multiple of 256 and a
    # multi-step 'parallel' row grid (>= 2 tiles, keeps both v7x TensorCores busy).
    x3 = jax.random.normal(kx3, (600, in_dim), jnp.float32)
    y3 = jax.block_until_ready(output_network_forward(x3, kparams_bf16))
    y3_ref = output_network_reference(x3, params)
    assert y3.shape == (600, out_dim), y3.shape
    assert jnp.allclose(y3, y3_ref, atol=5e-2, rtol=5e-2), "mismatch vs JAX reference (bf16, tiled)"

    print("KERNEL_OK")
</pallas_src>

<mosaic_0001>
module attributes {stable_mosaic.version = 11 : i64} {
  func.func @output_net_kernel(%arg0: i32, %arg1: memref<16x128xf32, #tpu.memory_space<vmem>>, %arg2: memref<128x128xf32, #tpu.memory_space<vmem>>, %arg3: memref<1x128xf32, #tpu.memory_space<vmem>>, %arg4: memref<128x128xf32, #tpu.memory_space<vmem>>, %arg5: memref<1x128xf32, #tpu.memory_space<vmem>>, %arg6: memref<128x128xf32, #tpu.memory_space<vmem>>, %arg7: memref<1x128xf32, #tpu.memory_space<vmem>>, %arg8: memref<16x128xf32, #tpu.memory_space<vmem>>) attributes {dimension_semantics = [#tpu.dimension_semantics<parallel>], iteration_bounds = array<i64: 1>, scalar_prefetch = 0 : i64, scratch_operands = 0 : i64, tpu.core_type = #tpu.core_type<tc>, window_params = [{transform_indices = @transform_0, window_bounds = array<i64: 16, 128>}, {pipeline_mode = #tpu.pipeline_mode<synchronous>, transform_indices = @transform_1, window_bounds = array<i64: 128, 128>}, {pipeline_mode = #tpu.pipeline_mode<synchronous>, transform_indices = @transform_2, window_bounds = array<i64: 1, 128>}, {pipeline_mode = #tpu.pipeline_mode<synchronous>, transform_indices = @transform_3, window_bounds = array<i64: 128, 128>}, {pipeline_mode = #tpu.pipeline_mode<synchronous>, transform_indices = @transform_4, window_bounds = array<i64: 1, 128>}, {pipeline_mode = #tpu.pipeline_mode<synchronous>, transform_indices = @transform_5, window_bounds = array<i64: 128, 128>}, {pipeline_mode = #tpu.pipeline_mode<synchronous>, transform_indices = @transform_6, window_bounds = array<i64: 1, 128>}, {transform_indices = @transform_7, window_bounds = array<i64: 16, 128>}]} {
    %c0 = arith.constant 0 : index
    %c0_0 = arith.constant 0 : index
    %0 = vector.load %arg1[%c0, %c0_0] : memref<16x128xf32, #tpu.memory_space<vmem>>, vector<16x128xf32>
    %c0_1 = arith.constant 0 : index
    %c0_2 = arith.constant 0 : index
    %1 = vector.load %arg2[%c0_1, %c0_2] : memref<128x128xf32, #tpu.memory_space<vmem>>, vector<128x128xf32>
    %cst = arith.constant dense<0.000000e+00> : vector<16x128xf32>
    %2 = tpu.matmul %0, %1, %cst {dimension_numbers = #tpu.dot_dimension_numbers<[1], [0], [0], [1], [0, 0, 1, 1], [], []>} : vector<16x128xf32>, vector<128x128xf32>, vector<16x128xf32> -> vector<16x128xf32>
    %c0_3 = arith.constant 0 : index
    %c0_4 = arith.constant 0 : index
    %3 = vector.load %arg3[%c0_3, %c0_4] : memref<1x128xf32, #tpu.memory_space<vmem>>, vector<1x128xf32>
    %4 = vector.broadcast %3 : vector<1x128xf32> to vector<16x128xf32>
    %5 = arith.addf %2, %4 : vector<16x128xf32>
    %cst_5 = arith.constant 0.00999999977 : f32
    %6 = vector.broadcast %cst_5 : f32 to vector<16x128xf32>
    %7 = arith.mulf %6, %5 : vector<16x128xf32>
    %8 = arith.maximumf %5, %7 : vector<16x128xf32>
    %c0_6 = arith.constant 0 : index
    %c0_7 = arith.constant 0 : index
    %9 = vector.load %arg4[%c0_6, %c0_7] : memref<128x128xf32, #tpu.memory_space<vmem>>, vector<128x128xf32>
    %cst_8 = arith.constant dense<0.000000e+00> : vector<16x128xf32>
    %10 = tpu.matmul %8, %9, %cst_8 {dimension_numbers = #tpu.dot_dimension_numbers<[1], [0], [0], [1], [0, 0, 1, 1], [], []>} : vector<16x128xf32>, vector<128x128xf32>, vector<16x128xf32> -> vector<16x128xf32>
    %c0_9 = arith.constant 0 : index
    %c0_10 = arith.constant 0 : index
    %11 = vector.load %arg5[%c0_9, %c0_10] : memref<1x128xf32, #tpu.memory_space<vmem>>, vector<1x128xf32>
    %12 = vector.broadcast %11 : vector<1x128xf32> to vector<16x128xf32>
    %13 = arith.addf %10, %12 : vector<16x128xf32>
    %cst_11 = arith.constant 0.00999999977 : f32
    %14 = vector.broadcast %cst_11 : f32 to vector<16x128xf32>
    %15 = arith.mulf %14, %13 : vector<16x128xf32>
    %16 = arith.maximumf %13, %15 : vector<16x128xf32>
    %c0_12 = arith.constant 0 : index
    %c0_13 = arith.constant 0 : index
    %17 = vector.load %arg6[%c0_12, %c0_13] : memref<128x128xf32, #tpu.memory_space<vmem>>, vector<128x128xf32>
    %cst_14 = arith.constant dense<0.000000e+00> : vector<16x128xf32>
    %18 = tpu.matmul %16, %17, %cst_14 {dimension_numbers = #tpu.dot_dimension_numbers<[1], [0], [0], [1], [0, 0, 1, 1], [], []>} : vector<16x128xf32>, vector<128x128xf32>, vector<16x128xf32> -> vector<16x128xf32>
    %c0_15 = arith.constant 0 : index
    %c0_16 = arith.constant 0 : index
    %19 = vector.load %arg7[%c0_15, %c0_16] : memref<1x128xf32, #tpu.memory_space<vmem>>, vector<1x128xf32>
    %20 = vector.broadcast %19 : vector<1x128xf32> to vector<16x128xf32>
    %21 = arith.addf %18, %20 : vector<16x128xf32>
    %c0_17 = arith.constant 0 : index
    %c0_18 = arith.constant 0 : index
    %22 = vector.load %arg8[%c0_17, %c0_18] : memref<16x128xf32, #tpu.memory_space<vmem>>, vector<16x128xf32>
    tpu.vector_store %arg8[%c0_17, %c0_18], %21 {strides = array<i32>} : memref<16x128xf32, #tpu.memory_space<vmem>>, vector<16x128xf32>,
    return
  }
  func.func @transform_0(%arg0: i32) -> (i32, i32) {
    %c0_i32 = arith.constant 0 : i32
    %c0_i32_0 = arith.constant 0 : i32
    return %arg0, %c0_i32 : i32, i32
  }
  func.func @transform_1(%arg0: i32) -> (i32, i32) {
    %c0_i32 = arith.constant 0 : i32
    %c0_i32_0 = arith.constant 0 : i32
    %c0_i32_1 = arith.constant 0 : i32
    return %c0_i32, %c0_i32_0 : i32, i32
  }
  func.func @transform_2(%arg0: i32) -> (i32, i32) {
    %c0_i32 = arith.constant 0 : i32
    %c0_i32_0 = arith.constant 0 : i32
    %c0_i32_1 = arith.constant 0 : i32
    return %c0_i32, %c0_i32_0 : i32, i32
  }
  func.func @transform_3(%arg0: i32) -> (i32, i32) {
    %c0_i32 = arith.constant 0 : i32
    %c0_i32_0 = arith.constant 0 : i32
    %c0_i32_1 = arith.constant 0 : i32
    return %c0_i32, %c0_i32_0 : i32, i32
  }
  func.func @transform_4(%arg0: i32) -> (i32, i32) {
    %c0_i32 = arith.constant 0 : i32
    %c0_i32_0 = arith.constant 0 : i32
    %c0_i32_1 = arith.constant 0 : i32
    return %c0_i32, %c0_i32_0 : i32, i32
  }
  func.func @transform_5(%arg0: i32) -> (i32, i32) {
    %c0_i32 = arith.constant 0 : i32
    %c0_i32_0 = arith.constant 0 : i32
    %c0_i32_1 = arith.constant 0 : i32
    return %c0_i32, %c0_i32_0 : i32, i32
  }
  func.func @transform_6(%arg0: i32) -> (i32, i32) {
    %c0_i32 = arith.constant 0 : i32
    %c0_i32_0 = arith.constant 0 : i32
    %c0_i32_1 = arith.constant 0 : i32
    return %c0_i32, %c0_i32_0 : i32, i32
  }
  func.func @transform_7(%arg0: i32) -> (i32, i32) {
    %c0_i32 = arith.constant 0 : i32
    %c0_i32_0 = arith.constant 0 : i32
    return %arg0, %c0_i32 : i32, i32
  }
}

</mosaic_0001>

<bundles_post_ra>
// kernel: tpu_custom_call.1
= control target key start
LH: loop header
LB: loop body
LE: loop exit
PB: predicated region body
PF: predicated region fallthrough
CT: control target
= control target key end

     0   :  { %12 = vsyncpa [#allocation3], 0  ;;  %s935_s0 = inlined_call_operand.hbm [shape: f32[16,128], index: 0, kind: input, shape index: {}]   ;;  %s936_s1 = inlined_call_operand.hbm [shape: f32[128,128], index: 1, kind: input, shape index: {}]   ;;  %s937_s2 = inlined_call_operand.vmem [shape: f32[1,128], index: 2, kind: input, shape index: {}]   ;;  %s938_s3 = inlined_call_operand.hbm [shape: f32[128,128], index: 3, kind: input, shape index: {}]   ;;  %s939_s4 = inlined_call_operand.vmem [shape: f32[1,128], index: 4, kind: input, shape index: {}]   ;;  %s940_s5 = inlined_call_operand.hbm [shape: f32[128,128], index: 5, kind: input, shape index: {}]   ;;  %s941_s6 = inlined_call_operand.vmem [shape: f32[1,128], index: 6, kind: input, shape index: {}]   ;;  %s942_s7 = inlined_call_operand.hbm [shape: f32[16,128], index: 7, kind: output, shape index: {}]  }
   0x1   :  { %13 = vsyncpa [#allocation6], 0 }
   0x2   :  { %14 = vsyncpa [#allocation9], 0 }
   0x3   :  { %15 = vsyncpa [#allocation4], 0  ;;  %s790_s24 = smov [#allocation5]   ;;  %s791_s26 = smov [#allocation2]  }
   0x4   :  { %s33_s25 = sshll.u32 %s790_s24, 4  ;;  %s21_s27 = sshll.u32 %s791_s26, 4  ;;  %s34_s25 = int_to_ptr.vmem [resolvable:$true] %s33_s25  ;;  %s837_s27 = int_to_ptr.vmem [resolvable:$true] %s21_s27 }
   0x5   :  { %s672_s30 = scalar_lea.hbm %s936_s1, 2048 }
   0x6   :  { %p673_p0 = scmp.ne.s32.totalorder %s936_s1, %s672_s30  ;;  %p676_p1 = scmp.lt.u32.totalorder %s672_s30, %s936_s1 }
   0x8   :  { %p678_p2 = pnand %p676_p1, %p673_p0 }
   0xa   :  { %681 = shalt.err (!%p678_p2)
}
   0xb   :  { %s682_s12 = scalar_lea.vmem %s34_s25, 2048  ;;  %p687_p4 = scmp.lt.s32.totalorder %s34_s25, %s34_s25 }
   0xc   :  { %p683_p3 = scmp.ne.s32.totalorder %s34_s25, %s682_s12  ;;  %p688_p5 = scmp.lt.s32.totalorder %s682_s12, %s682_s12 }
   0xe   :  { %p689_p6 = por %p688_p5, %p687_p4 }
  0x10   :  { %p690_p7 = pnand %p689_p6, %p683_p3 }
  0x12   :  { %693 = shalt.err (!%p690_p7)
}
  0x13   :  { %s792_s13 = smov 128   ;;  %s793_s14 = smov 8  }
  0x14   :  { %39 = dma.hbm_to_vmem [thread:$0]  %s936_s1, 2048, %s34_s25, [#allocation6], %s792_s13, %s792_s13, %s793_s14  }
  0x15   :  { %s694_s19 = scalar_lea.hbm %s935_s0, 256 }
  0x16   :  { %p695_p8 = scmp.ne.s32.totalorder %s935_s0, %s694_s19  ;;  %p698_p9 = scmp.lt.u32.totalorder %s694_s19, %s935_s0 }
  0x18   :  { %p700_p10 = pnand %p698_p9, %p695_p8 }
  0x1a   :  { %703 = shalt.err (!%p700_p10)
}
  0x1b   :  { %s704_s24 = scalar_lea.vmem %s837_s27, 256  ;;  %p709_p12 = scmp.lt.s32.totalorder %s837_s27, %s837_s27 }
  0x1c   :  { %p705_p11 = scmp.ne.s32.totalorder %s837_s27, %s704_s24  ;;  %p710_p13 = scmp.lt.s32.totalorder %s704_s24, %s704_s24 }
  0x1e   :  { %p711_p0 = por %p710_p13, %p709_p12 }
  0x20   :  { %p712_p1 = pnand %p711_p0, %p705_p11 }
  0x22   :  { %715 = shalt.err (!%p712_p1)
}
  0x23   :  { %27 = dma.hbm_to_vmem [thread:$0]  %s935_s0, 256, %s837_s27, [#allocation3], %s792_s13, %s792_s13, %s793_s14  }
  0x24   :  { %s794_s26 = smov [#allocation7]   ;;  %s795_s29 = smov [#allocation8]  }
  0x25   :  { %s47_s28 = sshll.u32 %s794_s26, 4  ;;  %s61_s30 = sshll.u32 %s795_s29, 4  ;;  %s48_s28 = int_to_ptr.vmem [resolvable:$true] %s47_s28  ;;  %s874_s30 = int_to_ptr.vmem [resolvable:$true] %s61_s30 }
  0x26   :  { %s716_s10 = scalar_lea.hbm %s938_s3, 2048 }
  0x27   :  { %p717_p2 = scmp.ne.s32.totalorder %s938_s3, %s716_s10  ;;  %p720_p3 = scmp.lt.u32.totalorder %s716_s10, %s938_s3 }
  0x29   :  { %p722_p4 = pnand %p720_p3, %p717_p2 }
  0x2b   :  { %725 = shalt.err (!%p722_p4)
}
  0x2c   :  { %s726_s0 = scalar_lea.vmem %s48_s28, 2048  ;;  %p731_p6 = scmp.lt.s32.totalorder %s48_s28, %s48_s28 }
  0x2d   :  { %p727_p5 = scmp.ne.s32.totalorder %s48_s28, %s726_s0  ;;  %p732_p7 = scmp.lt.s32.totalorder %s726_s0, %s726_s0 }
  0x2f   :  { %p733_p8 = por %p732_p7, %p731_p6 }
  0x31   :  { %p734_p9 = pnand %p733_p8, %p727_p5 }
  0x33   :  { %737 = shalt.err (!%p734_p9)
}
  0x34   :  { %53 = dma.hbm_to_vmem [thread:$0]  %s938_s3, 2048, %s48_s28, [#allocation6], %s792_s13, %s792_s13, %s793_s14  }
  0x35   :  { %s738_s20 = scalar_lea.hbm %s940_s5, 2048 }
  0x36   :  { %p739_p10 = scmp.ne.s32.totalorder %s940_s5, %s738_s20  ;;  %p742_p11 = scmp.lt.u32.totalorder %s738_s20, %s940_s5 }
  0x38   :  { %p744_p12 = pnand %p742_p11, %p739_p10 }
  0x3a   :  { %747 = shalt.err (!%p744_p12)
}
  0x3b   :  { %s748_s1 = scalar_lea.vmem %s874_s30, 2048  ;;  %p753_p0 = scmp.lt.s32.totalorder %s874_s30, %s874_s30 }
  0x3c   :  { %p749_p13 = scmp.ne.s32.totalorder %s874_s30, %s748_s1  ;;  %p754_p1 = scmp.lt.s32.totalorder %s748_s1, %s748_s1 }
  0x3e   :  { %p755_p2 = por %p754_p1, %p753_p0 }
  0x40   :  { %p756_p3 = pnand %p755_p2, %p749_p13 }
  0x42   :  { %759 = shalt.err (!%p756_p3)
}
  0x43   :  { %67 = dma.hbm_to_vmem [thread:$0]  %s940_s5, 2048, %s874_s30, [#allocation9], %s792_s13, %s792_s13, %s793_s14  }
  0x44   :  { %782 = dma.done.wait [#allocation3], 256  }
  0x45   :  { %783 = vsyncadd [#allocation3], 4294967040 }
  0x46   :  { %784 = dma.done.wait [#allocation6], 4096  }
  0x47   :  { %785 = vsyncadd [#allocation6], 4294963200 }
  0x48   :  { %786 = dma.done.wait [#allocation9], 2048  }
  0x49   :  { %787 = vsyncadd [#allocation9], 4294965248  ;;  %v84_v0 = vld [vmem:[#allocation5] sm:$0xff]  ;;  %v85_v1 = vld [vmem:[#allocation5 + $0x8] sm:$0xff]  ;;  %s796_s8 = smov [#allocation10]  }
  0x4a   :  { %v86_v2 = vld [vmem:[#allocation5 + $0x10] sm:$0xff]  ;;  %v569_v3 = vpack.c.bf16 %v85_v1, %v84_v0  ;;  %v87_v4 = vld [vmem:[#allocation5 + $0x18] sm:$0xff]  ;;  %v88_v6 = vld [vmem:[#allocation5 + $0x20] sm:$0xff]  ;;  %s393_s9 = sshll.u32 %s796_s8, 4  ;;  %s394_s9 = int_to_ptr.vmem [resolvable:$true] %s393_s9 }
  0x4b   :  { %v573_v5 = vpack.c.bf16 %v87_v4, %v86_v2  ;;  %v89_v7 = vld [vmem:[#allocation5 + $0x28] sm:$0xff]  ;;  %v90_v9 = vld [vmem:[#allocation5 + $0x30] sm:$0xff]  ;;  %v91_v10 = vld [vmem:[#allocation5 + $0x38] sm:$0xff]  ;;  %p765_p5 = scmp.lt.s32.totalorder %s394_s9, %s394_s9 }
  0x4c   :  { %570 = vmatprep.subr.bf16.mxu0 %v569_v3  ;;  %v577_v8 = vpack.c.bf16 %v89_v7, %v88_v6  ;;  %v82_v11 = vld [vmem:[#allocation2] sm:$0xff]  ;;  %v186_v12 = vld [vmem:[#allocation7] sm:$0xff]  ;;  %v187_v13 = vld [vmem:[#allocation7 + $0x8] sm:$0xff]  ;;  %v581_v20 = vpack.c.bf16 %v91_v10, %v90_v9 }
  0x4d   :  { %572 = vmatpush3.bf16.msra.mxu0 %v569_v3  ;;  %496 = vmatprep.mubr.f32.mxu0 %v82_v11  ;;  %v188_v14 = vld [vmem:[#allocation7 + $0x10] sm:$0xff]  ;;  %v601_v15 = vpack.c.bf16 %v187_v13, %v186_v12  ;;  %v189_v16 = vld [vmem:[#allocation7 + $0x18] sm:$0xff]  ;;  %v190_v18 = vld [vmem:[#allocation7 + $0x20] sm:$0xff] }
  0x4e   :  { %574 = vmatprep.subr.bf16.mxu0 %v573_v5  ;;  %v605_v17 = vpack.c.bf16 %v189_v16, %v188_v14  ;;  %v191_v19 = vld [vmem:[#allocation7 + $0x28] sm:$0xff]  ;;  %v92_v21 = vld [vmem:[#allocation5 + $0x40] sm:$0xff]  ;;  %v192_v24 = vld [vmem:[#allocation7 + $0x30] sm:$0xff] }
  0x4f   :  { %602 = vmatprep.subr.bf16.mxu1 %v601_v15  ;;  %v93_v22 = vld [vmem:[#allocation5 + $0x48] sm:$0xff]  ;;  %v609_v23 = vpack.c.bf16 %v191_v19, %v190_v18  ;;  %v193_v25 = vld [vmem:[#allocation7 + $0x38] sm:$0xff]  ;;  %v94_v27 = vld [vmem:[#allocation5 + $0x50] sm:$0xff] }
  0x50   :  { %604 = vmatpush3.bf16.msra.mxu1 %v601_v15  ;;  %v585_v26 = vpack.c.bf16 %v93_v22, %v92_v21  ;;  %v95_v28 = vld [vmem:[#allocation5 + $0x58] sm:$0xff]  ;;  %v613_v29 = vpack.c.bf16 %v193_v25, %v192_v24  ;;  %v194_v30 = vld [vmem:[#allocation7 + $0x40] sm:$0xff]  ;;  %v195_v31 = vld [vmem:[#allocation7 + $0x48] sm:$0xff] }
  0x51   :  { %576 = vmatpush3.bf16.msra.mxu0 %v573_v5  ;;  %606 = vmatprep.subr.bf16.mxu1 %v605_v17  ;;  %v589_v32 = vpack.c.bf16 %v95_v28, %v94_v27  ;;  %v96_v33 = vld [vmem:[#allocation5 + $0x60] sm:$0xff]  ;;  %v97_v34 = vld [vmem:[#allocation5 + $0x68] sm:$0xff]  ;;  %v617_v35 = vpack.c.bf16 %v195_v31, %v194_v30  ;;  %v196_v36 = vld [vmem:[#allocation7 + $0x50] sm:$0xff] }
  0x52   :  { %578 = vmatprep.subr.bf16.mxu0 %v577_v8  ;;  %v197_v37 = vld [vmem:[#allocation7 + $0x58] sm:$0xff]  ;;  %v593_v38 = vpack.c.bf16 %v97_v34, %v96_v33  ;;  %v98_v39 = vld [vmem:[#allocation5 + $0x70] sm:$0xff]  ;;  %v198_v44 = vld [vmem:[#allocation7 + $0x60] sm:$0xff] }
  0x53   :  { %v99_v40 = vld [vmem:[#allocation5 + $0x78] sm:$0xff]  ;;  %v621_v41 = vpack.c.bf16 %v197_v37, %v196_v36  ;;  %v199_v45 = vld [vmem:[#allocation7 + $0x68] sm:$0xff]  ;;  %v200_v47 = vld [vmem:[#allocation7 + $0x70] sm:$0xff] }
  0x54   :  { %608 = vmatpush3.bf16.msra.mxu1 %v605_v17  ;;  %v597_v42 = vpack.c.bf16 %v99_v40, %v98_v39  ;;  %v83_v43 = vld [vmem:[#allocation2 + $0x8] sm:$0xff]  ;;  %v625_v46 = vpack.c.bf16 %v199_v45, %v198_v44  ;;  %v288_v50 = vld [vmem:[#allocation8] sm:$0xff]  ;;  %v289_v51 = vld [vmem:[#allocation8 + $0x8] sm:$0xff] }
  0x55   :  { %580 = vmatpush3.bf16.msra.mxu0 %v577_v8  ;;  %610 = vmatprep.subr.bf16.mxu1 %v609_v23  ;;  %v201_v48 = vld [vmem:[#allocation7 + $0x78] sm:$0xff]  ;;  %v290_v52 = vld [vmem:[#allocation8 + $0x10] sm:$0xff]  ;;  %v633_v53 = vpack.c.bf16 %v289_v51, %v288_v50  ;;  %v292_v56 = vld [vmem:[#allocation8 + $0x20] sm:$0xff] }
  0x56   :  { %582 = vmatprep.subr.bf16.mxu0 %v581_v20  ;;  %v629_v49 = vpack.c.bf16 %v201_v48, %v200_v47  ;;  %v291_v54 = vld [vmem:[#allocation8 + $0x18] sm:$0xff]  ;;  %v293_v57 = vld [vmem:[#allocation8 + $0x28] sm:$0xff]  ;;  %v294_v59 = vld [vmem:[#allocation8 + $0x30] sm:$0xff] }
  0x57   :  { %v637_v55 = vpack.c.bf16 %v291_v54, %v290_v52  ;;  %v641_v58 = vpack.c.bf16 %v293_v57, %v292_v56  ;;  %v295_v60 = vld [vmem:[#allocation8 + $0x38] sm:$0xff]  ;;  %v296_v62 = vld [vmem:[#allocation8 + $0x40] sm:$0xff]  ;;  %v297_v63 = vld [vmem:[#allocation8 + $0x48] sm:$0xff] }
  0x58   :  { %612 = vmatpush3.bf16.msra.mxu1 %v609_v23  ;;  %v645_v61 = vpack.c.bf16 %v295_v60, %v294_v59  ;;  %v649_v0 = vpack.c.bf16 %v297_v63, %v296_v62  ;;  %v298_v1 = vld [vmem:[#allocation8 + $0x50] sm:$0xff]  ;;  %v299_v2 = vld [vmem:[#allocation8 + $0x58] sm:$0xff]  ;;  %v300_v13 = vld [vmem:[#allocation8 + $0x60] sm:$0xff] }
  0x59   :  { %584 = vmatpush3.bf16.msra.mxu0 %v581_v20  ;;  %614 = vmatprep.subr.bf16.mxu1 %v613_v29  ;;  %v653_v3 = vpack.c.bf16 %v299_v2, %v298_v1  ;;  %v407_v4 = vld [vmem:[%s937_s2] ss:$0 sm:$0xff]  ;;  %v301_v14 = vld [vmem:[#allocation8 + $0x68] sm:$0xff]  ;;  %v303_v17 = vld [vmem:[#allocation8 + $0x78] sm:$0xff] }
  0x5a   :  { %586 = vmatprep.subr.bf16.mxu0 %v585_v26  ;;  %v657_v15 = vpack.c.bf16 %v301_v14, %v300_v13  ;;  %v302_v16 = vld [vmem:[#allocation8 + $0x70] sm:$0xff] }
  0x5b   :  { %v661_v18 = vpack.c.bf16 %v303_v17, %v302_v16  ;;  %v408_v19 = vld [vmem:[%s939_s4] ss:$0 sm:$0xff]  ;;  %s760_s4 = scalar_lea.vmem %s394_s9, 256 }
  0x5c   :  { %616 = vmatpush3.bf16.msra.mxu1 %v613_v29  ;;  %v409_v28 = vld [vmem:[%s941_s6] ss:$0 sm:$0xff]  ;;  %p761_p4 = scmp.ne.s32.totalorder %s394_s9, %s760_s4  ;;  %p766_p6 = scmp.lt.s32.totalorder %s760_s4, %s760_s4 }
  0x5d   :  { %588 = vmatpush3.bf16.msra.mxu0 %v585_v26  ;;  %618 = vmatprep.subr.bf16.mxu1 %v617_v35 }
  0x5e   :  { %590 = vmatprep.subr.bf16.mxu0 %v589_v32  ;;  %p767_p7 = por %p766_p6, %p765_p5 }
  0x60   :  { %620 = vmatpush3.bf16.msra.mxu1 %v617_v35  ;;  %p768_p8 = pnand %p767_p7, %p761_p4 }
  0x61   :  { %592 = vmatpush3.bf16.msra.mxu0 %v589_v32  ;;  %622 = vmatprep.subr.bf16.mxu1 %v621_v41 }
  0x62   :  { %594 = vmatprep.subr.bf16.mxu0 %v593_v38 }
  0x64   :  { %624 = vmatpush3.bf16.msra.mxu1 %v621_v41 }
  0x65   :  { %596 = vmatpush3.bf16.msra.mxu0 %v593_v38  ;;  %626 = vmatprep.subr.bf16.mxu1 %v625_v46 }
  0x66   :  { %598 = vmatprep.subr.bf16.mxu0 %v597_v42 }
  0x68   :  { %628 = vmatpush3.bf16.msra.mxu1 %v625_v46 }
  0x69   :  { %600 = vmatpush3.bf16.msra.mxu0 %v597_v42  ;;  %630 = vmatprep.subr.bf16.mxu1 %v629_v49 }
  0x6a   :  { %634 = vmatprep.subr.bf16.mxu0 %v633_v53 }
  0x6c   :  { %497 = vmatmul.mubr.f32.vlgmr.msra.gmra.mrb[0].mxu0 %v83_v43  ;;  %632 = vmatpush3.bf16.msra.mxu1 %v629_v49 }
  0x6d   :  { %636 = vmatpush3.bf16.msra.mxu0 %v633_v53 }
  0x6e   :  { %638 = vmatprep.subr.bf16.mxu0 %v637_v55 }
  0x71   :  { %640 = vmatpush3.bf16.msra.mxu0 %v637_v55 }
  0x72   :  { %642 = vmatprep.subr.bf16.mxu0 %v641_v58 }
  0x75   :  { %644 = vmatpush3.bf16.msra.mxu0 %v641_v58 }
  0x76   :  { %646 = vmatprep.subr.bf16.mxu0 %v645_v61 }
  0x79   :  { %648 = vmatpush3.bf16.msra.mxu0 %v645_v61 }
  0x7a   :  { %650 = vmatprep.subr.bf16.mxu0 %v649_v0 }
  0x7d   :  { %652 = vmatpush3.bf16.msra.mxu0 %v649_v0 }
  0x7e   :  { %654 = vmatprep.subr.bf16.mxu0 %v653_v3 }
  0x81   :  { %656 = vmatpush3.bf16.msra.mxu0 %v653_v3 }
  0x82   :  { %658 = vmatprep.subr.bf16.mxu0 %v657_v15 }
  0x85   :  { %660 = vmatpush3.bf16.msra.mxu0 %v657_v15 }
  0x86   :  { %662 = vmatprep.subr.bf16.mxu0 %v661_v18 }
  0x89   :  { %664 = vmatpush3.bf16.msra.mxu0 %v661_v18 }
 0x13f   :  { %v498_v5 = vpop.f32.mrb[0].mxu0 }
 0x140   :  { %v179_v6 = vadd.f32 %v498_v5, %v407_v4  ;;  %v173_v7 = vpop.f32.mrb[1].mxu0 }
 0x141   :  { %v174_v8 = vadd.f32 %v407_v4, %v173_v7 }
 0x142   :  { %v183_v9 = vmul.f32 0.01, %v179_v6 }
 0x143   :  { %v182_v10 = vmul.f32 0.01, %v174_v8 }
 0x144   :  { %v185_v12 = vmax.f32 %v179_v6, %v183_v9 }
 0x145   :  { %v184_v11 = vmax.f32 %v174_v8, %v182_v10 }
 0x147   :  { %531 = vmatprep.mubr.f32.mxu1 %v184_v11 }
 0x148   :  { %532 = vmatmul.mubr.f32.vlgmr.msra.gmra.mrb[0].mxu1 %v185_v12 }
 0x21b   :  { %v533_v20 = vpop.f32.mrb[0].mxu1 }
 0x21c   :  { %v281_v21 = vadd.f32 %v533_v20, %v408_v19  ;;  %v275_v22 = vpop.f32.mrb[1].mxu1 }
 0x21d   :  { %v276_v23 = vadd.f32 %v408_v19, %v275_v22 }
 0x21e   :  { %v285_v24 = vmul.f32 0.01, %v281_v21 }
 0x21f   :  { %v284_v25 = vmul.f32 0.01, %v276_v23 }
 0x220   :  { %v287_v27 = vmax.f32 %v281_v21, %v285_v24 }
 0x221   :  { %v286_v26 = vmax.f32 %v276_v23, %v284_v25 }
 0x223   :  { %566 = vmatprep.mubr.f32.mxu0 %v286_v26 }
 0x224   :  { %567 = vmatmul.mubr.f32.vlgmr.msra.gmra.mrb[2].mxu0 %v287_v27 }
 0x2f7   :  { %v568_v29 = vpop.f32.mrb[2].mxu0 }
 0x2f8   :  { %v383_v30 = vadd.f32 %v568_v29, %v409_v28  ;;  %v377_v31 = vpop.f32.mrb[3].mxu0 }
 0x2f9   :  { %v378_v32 = vadd.f32 %v409_v28, %v377_v31 }
 0x2fa   :  { %387 = vst [vmem:[#allocation10 + $0x8] sm:$0xff] %v383_v30 }
 0x2fb   :  { %386 = vst [vmem:[#allocation10] sm:$0xff] %v378_v32 }
 0x2fc   :  { %771 = shalt.err (!%p768_p8)
}
 0x2fd   :  { %s772_s6 = scalar_lea.hbm %s942_s7, 256 }
 0x2fe   :  { %p773_p9 = scmp.ne.s32.totalorder %s942_s7, %s772_s6  ;;  %p776_p10 = scmp.lt.u32.totalorder %s772_s6, %s942_s7 }
 0x300   :  { %p778_p11 = pnand %p776_p10, %p773_p9 }
 0x302   :  { %781 = shalt.err (!%p778_p11)
}
 0x303   :  { %399 = dma.vmem_to_hbm [thread:$0]  %s394_s9, 256, %s942_s7, [#allocation4], %s792_s13, %s792_s13, %s793_s14  }
 0x304   :  { %788 = dma.done.wait [#allocation4], 256  }
 0x305   :  { %789 = vsyncadd [#allocation4], 4294967040 }
 0x306   :  { %403 = vsyncpa [#allocation3], 1 }
 0x307   :  { %404 = vsyncpa [#allocation6], 1 }
 0x308   :  { %405 = vsyncpa [#allocation9], 1 }
 0x309   :  { %406 = vsyncpa [#allocation4], 1 }

</bundles_post_ra>
